<compile_context>
chip_gen: v7x
topology: tpu7x:2x2x1
jax: 0.10.0
libtpu: 0.0.40
codegen_flags: <defaults>
</compile_context>

<pallas_src>
import functools

import jax
import jax.numpy as jnp
import numpy as np
from jax import lax
from jax.experimental import pallas as pl
from jax.experimental.pallas import tpu as pltpu


def _self_attention_kernel(x_ref, w1_ref, w2_ref, o_ref, *, b_blk, seq, out_sz):
    # x_ref:  (b_blk*seq, D)    bf16  (batch folded into the MXU M-dim)
    # w1_ref: (D, H)            bf16  (resident: constant index map)
    # w2_ref: (H, O)            bf16  (resident: constant index map)
    # o_ref:  (b_blk*out_sz, seq) f32 (lane-dense flattened output slab)
    x = x_ref[...]
    w1 = w1_ref[...]
    w2 = w2_ref[...]

    # linear_1 (no bias) + tanh — one MXU matmul with M = b_blk*seq, f32 accumulate.
    h = jnp.tanh(jnp.dot(x, w1, preferred_element_type=jnp.float32))  # (b_blk*seq, H)
    h_bf = h.astype(jnp.bfloat16)

    # linear_2, fused over the whole slab and computed pre-transposed:
    #   scores_t = w2^T @ h^T  -> (O, b_blk*seq)
    # One MXU op with N = b_blk*seq; the softmax reductions below are lane-axis
    # reductions and no XLU transpose of the result is needed.
    scores_t = lax.dot_general(w2, h_bf, (((0,), (1,)), ((), ())),
                               preferred_element_type=jnp.float32)

    # Per-batch softmax over the sequence (lane) windows.  b_blk is a small,
    # bounded static trip count (see _default_b_blk), so a static unroll is fine.
    parts = []
    for b in range(b_blk):
        st = scores_t[:, b * seq:(b + 1) * seq]              # (O, seq), static lane slice
        m = jnp.max(st, axis=-1, keepdims=True)              # (O, 1)
        e = jnp.exp(st - m)                                  # (O, seq)
        denom = jnp.sum(e, axis=-1, keepdims=True)           # (O, 1)
        inv = pl.reciprocal(denom, approx=True)              # EUP slot, ~free
        parts.append((e * inv).astype(o_ref.dtype))          # (O, seq), already output layout

    # Write the whole (b_blk*out_sz, seq) block.  When the pieces are sublane-
    # tile aligned (out_sz % 8 == 0) use a single dense store; otherwise use
    # static-slice stores (the HBM writeback per grid step is one contiguous
    # block either way — out_shape is the flattened 2-D (B*O, S) array).
    if b_blk == 1:
        o_ref[...] = parts[0]
    elif out_sz % 8 == 0:
        o_ref[...] = jnp.concatenate(parts, axis=0)
    else:
        for b in range(b_blk):
            o_ref[b * out_sz:(b + 1) * out_sz, :] = parts[b]


def _default_b_blk(B, S, O):
    """Pick the batch block size.

    Preferences, in order:
      * partial blocks stay on tile boundaries: (b_blk*S) % 16 == 0 (bf16
        packed sublane tile for the x block) and (b_blk*O) % 8 == 0 (f32 out
        block) — unless the block covers the full array, which is always legal;
      * >= 4 grid steps (restores DMA/compute double-buffer overlap; lets the
        "parallel" axis shard across both TensorCores on v7x), falling back to
        >= 2, then 1;
      * at most ~1024 folded rows per block (a few MiB of VMEM) and a bounded
        static softmax unroll (b_blk <= 64).
    """
    divisors = [d for d in range(1, B + 1) if B % d == 0]
    aligned = [d for d in divisors
               if d == B or ((d * S) % 16 == 0 and (d * O) % 8 == 0)]
    if not aligned:
        aligned = [B]
    for min_blocks in (4, 2, 1):
        cands = [d for d in aligned if B // d >= min_blocks]
        if not cands:
            continue
        good = [d for d in cands if d * S <= 1024 and d <= 64]
        return max(good) if good else min(cands)
    return B


def self_attention(x, w1, w2, *, b_blk=None):
    """x: (B, S, D), w1: (D, H), w2: (H, O) -> (B, O, S) f32."""
    B, S, D = x.shape
    H = w1.shape[1]
    O = w2.shape[1]
    assert w1.shape == (D, H) and w2.shape == (H, O)

    if b_blk is None:
        b_blk = _default_b_blk(B, S, O)
    assert B % b_blk == 0, "b_blk must divide B"
    n_blocks = B // b_blk
    if n_blocks > 1:
        # Partial blocks must sit on sublane-tile boundaries (bf16 x: 16 rows,
        # f32 out: 8 rows); full-array blocks are always legal.
        assert (b_blk * S) % 16 == 0 and (b_blk * O) % 8 == 0, (
            "with b_blk < B, b_blk*S must be a multiple of 16 and "
            "b_blk*O a multiple of 8")

    blk_rows = b_blk * S

    # VMEM budget: bf16 x block (double-buffered) + f32 out block (double-
    # buffered) + bf16 weights (counted double-buffered to be safe) + in-kernel
    # intermediates (h f32, h_bf bf16, scores_t / exp / normalized slab f32).
    vmem_need = (
        2 * blk_rows * D * 2                 # x block, bf16, x2 buffers
        + 2 * (b_blk * O) * S * 4            # out block, f32, x2 buffers
        + 2 * (D * H + H * O) * 2            # bf16 weights (resident)
        + blk_rows * H * 4                   # h (f32)
        + blk_rows * H * 2                   # h_bf
        + 3 * O * blk_rows * 4               # scores_t, exp, normalized parts
    )
    vmem_limit = 32 * 1024 * 1024            # explicit; valid on v5e/v6e (128 MiB) and v7x (64 MiB)
    assert vmem_need < vmem_limit - (8 << 20), (
        "blocks too large for VMEM; pass a smaller b_blk "
        "(or tile S with an online softmax)")

    # Halve the dominant HBM stream: ship x as bf16, batch folded into rows.
    x_bf = x.reshape(B * S, D).astype(jnp.bfloat16)
    w1_bf = w1.astype(jnp.bfloat16)
    w2_bf = w2.astype(jnp.bfloat16)

    kernel = functools.partial(_self_attention_kernel, b_blk=b_blk, seq=S, out_sz=O)

    out_flat = pl.pallas_call(
        kernel,
        out_shape=jax.ShapeDtypeStruct((B * O, S), jnp.float32),
        grid_spec=pltpu.PrefetchScalarGridSpec(
            num_scalar_prefetch=0,
            grid=(n_blocks,),
            in_specs=[
                pl.BlockSpec((blk_rows, D), lambda i: (i, 0)),
                # Constant index maps -> weights DMA'd once and kept resident.
                # (pipeline_mode=pl.Buffered(1) would drop their second buffer;
                # negligible at D=H=32, so omitted for robustness.)
                pl.BlockSpec((D, H), lambda i: (0, 0)),
                pl.BlockSpec((H, O), lambda i: (0, 0)),
            ],
            out_specs=pl.BlockSpec((b_blk * O, S), lambda i: (i, 0)),
        ),
        compiler_params=pltpu.CompilerParams(
            dimension_semantics=("parallel",),
            vmem_limit_bytes=vmem_limit,
        ),
    )(x_bf, w1_bf, w2_bf)

    # Contiguous reshape (free in XLA): (B*O, S) -> (B, O, S).
    return out_flat.reshape(B, O, S)


def _reference(x, w1, w2):
    h = jnp.tanh(jnp.einsum("bsd,dh->bsh", x, w1))
    scores = jnp.einsum("bsh,ho->bso", h, w2)
    w = jax.nn.softmax(scores, axis=1)        # softmax over seq dim (dim=1)
    return jnp.transpose(w, (0, 2, 1))        # (B, O, S)


if __name__ == "__main__":
    # Small shapes implied by the module's forward: (batch, seq, input_size).
    B, S, D, H, O = 2, 8, 32, 32, 4

    key = jax.random.PRNGKey(0)
    kx, k1, k2 = jax.random.split(key, 3)

    x = jax.random.normal(kx, (B, S, D), dtype=jnp.float32)

    # Deterministic init mimicking nn.Linear (uniform +/- 1/sqrt(in_features)), bias=False.
    bound1 = 1.0 / np.sqrt(D)
    bound2 = 1.0 / np.sqrt(H)
    # PyTorch stores Linear weight as (out, in); we keep the transposed (in, out) layout.
    w1 = jax.random.uniform(k1, (D, H), minval=-bound1, maxval=bound1, dtype=jnp.float32)
    w2 = jax.random.uniform(k2, (H, O), minval=-bound2, maxval=bound2, dtype=jnp.float32)

    out = self_attention(x, w1, w2)
    out = jax.block_until_ready(out)

    ref = _reference(x, w1, w2)
    # Tolerance loosened for bf16 MXU operands and the approx reciprocal
    # (softmax columns sum to 1 only to ~1e-3 relative).
    np.testing.assert_allclose(np.asarray(out), np.asarray(ref), atol=2e-2, rtol=2e-2)

    print("KERNEL_OK")
</pallas_src>

<mosaic_0001>
module attributes {stable_mosaic.version = 11 : i64} {
  func.func @_self_attention_kernel(%arg0: i32, %arg1: memref<16x32xbf16, #tpu.memory_space<vmem>>, %arg2: memref<32x32xbf16, #tpu.memory_space<vmem>>, %arg3: memref<32x4xbf16, #tpu.memory_space<vmem>>, %arg4: memref<8x8xf32, #tpu.memory_space<vmem>>) attributes {dimension_semantics = [#tpu.dimension_semantics<parallel>], iteration_bounds = array<i64: 1>, scalar_prefetch = 0 : i64, scratch_operands = 0 : i64, tpu.core_type = #tpu.core_type<tc>, window_params = [{transform_indices = @transform_0, window_bounds = array<i64: 16, 32>}, {pipeline_mode = #tpu.pipeline_mode<synchronous>, transform_indices = @transform_1, window_bounds = array<i64: 32, 32>}, {pipeline_mode = #tpu.pipeline_mode<synchronous>, transform_indices = @transform_2, window_bounds = array<i64: 32, 4>}, {transform_indices = @transform_3, window_bounds = array<i64: 8, 8>}]} {
    %c0 = arith.constant 0 : index
    %c0_0 = arith.constant 0 : index
    %0 = vector.load %arg1[%c0, %c0_0] : memref<16x32xbf16, #tpu.memory_space<vmem>>, vector<16x32xbf16>
    %c0_1 = arith.constant 0 : index
    %c0_2 = arith.constant 0 : index
    %1 = vector.load %arg2[%c0_1, %c0_2] : memref<32x32xbf16, #tpu.memory_space<vmem>>, vector<32x32xbf16>
    %c0_3 = arith.constant 0 : index
    %c0_4 = arith.constant 0 : index
    %2 = vector.load %arg3[%c0_3, %c0_4] : memref<32x4xbf16, #tpu.memory_space<vmem>>, vector<32x4xbf16>
    %cst = arith.constant dense<0.000000e+00> : vector<16x32xf32>
    %3 = tpu.matmul %0, %1, %cst {dimension_numbers = #tpu.dot_dimension_numbers<[1], [0], [0], [1], [0, 0, 1, 1], [], []>} : vector<16x32xbf16>, vector<32x32xbf16>, vector<16x32xf32> -> vector<16x32xf32>
    %4 = math.tanh %3 : vector<16x32xf32>
    %5 = arith.truncf %4 : vector<16x32xf32> to vector<16x32xbf16>
    %cst_5 = arith.constant dense<0.000000e+00> : vector<4x16xf32>
    %6 = tpu.matmul %2, %5, %cst_5 {dimension_numbers = #tpu.dot_dimension_numbers<[0], [1], [1], [0], [0, 1, 1, 0], [], []>} : vector<32x4xbf16>, vector<16x32xbf16>, vector<4x16xf32> -> vector<4x16xf32>
    %7 = vector.extract_strided_slice %6 {offsets = [0, 0], sizes = [4, 8], strides = [1, 1]} : vector<4x16xf32> to vector<4x8xf32>
    %cst_6 = arith.constant dense<0xFF800000> : vector<4xf32>
    %8 = vector.multi_reduction <maximumf>, %7, %cst_6 [1] : vector<4x8xf32> to vector<4xf32>
    %9 = vector.shape_cast %8 : vector<4xf32> to vector<4x1xf32>
    %10 = vector.broadcast %9 : vector<4x1xf32> to vector<4x8xf32>
    %11 = arith.subf %7, %10 : vector<4x8xf32>
    %12 = math.exp %11 : vector<4x8xf32>
    %cst_7 = arith.constant dense<0.000000e+00> : vector<4xf32>
    %13 = vector.multi_reduction <add>, %12, %cst_7 [1] : vector<4x8xf32> to vector<4xf32>
    %14 = vector.shape_cast %13 : vector<4xf32> to vector<4x1xf32>
    %15 = tpu.reciprocal %14 {approx = true} : vector<4x1xf32> -> vector<4x1xf32>
    %16 = vector.broadcast %15 : vector<4x1xf32> to vector<4x8xf32>
    %17 = arith.mulf %12, %16 : vector<4x8xf32>
    %18 = vector.extract_strided_slice %6 {offsets = [0, 8], sizes = [4, 8], strides = [1, 1]} : vector<4x16xf32> to vector<4x8xf32>
    %cst_8 = arith.constant dense<0xFF800000> : vector<4xf32>
    %19 = vector.multi_reduction <maximumf>, %18, %cst_8 [1] : vector<4x8xf32> to vector<4xf32>
    %20 = vector.shape_cast %19 : vector<4xf32> to vector<4x1xf32>
    %21 = vector.broadcast %20 : vector<4x1xf32> to vector<4x8xf32>
    %22 = arith.subf %18, %21 : vector<4x8xf32>
    %23 = math.exp %22 : vector<4x8xf32>
    %cst_9 = arith.constant dense<0.000000e+00> : vector<4xf32>
    %24 = vector.multi_reduction <add>, %23, %cst_9 [1] : vector<4x8xf32> to vector<4xf32>
    %25 = vector.shape_cast %24 : vector<4xf32> to vector<4x1xf32>
    %26 = tpu.reciprocal %25 {approx = true} : vector<4x1xf32> -> vector<4x1xf32>
    %27 = vector.broadcast %26 : vector<4x1xf32> to vector<4x8xf32>
    %28 = arith.mulf %23, %27 : vector<4x8xf32>
    %c0_10 = arith.constant 0 : index
    %c0_11 = arith.constant 0 : index
    %29 = vector.load %arg4[%c0_10, %c0_11] : memref<8x8xf32, #tpu.memory_space<vmem>>, vector<4x8xf32>
    tpu.vector_store %arg4[%c0_10, %c0_11], %17 {strides = array<i32>} : memref<8x8xf32, #tpu.memory_space<vmem>>, vector<4x8xf32>,
    %c4 = arith.constant 4 : index
    %c0_12 = arith.constant 0 : index
    %30 = vector.load %arg4[%c4, %c0_12] : memref<8x8xf32, #tpu.memory_space<vmem>>, vector<4x8xf32>
    tpu.vector_store %arg4[%c4, %c0_12], %28 {strides = array<i32>} : memref<8x8xf32, #tpu.memory_space<vmem>>, vector<4x8xf32>,
    return
  }
  func.func @transform_0(%arg0: i32) -> (i32, i32) {
    %c0_i32 = arith.constant 0 : i32
    %c0_i32_0 = arith.constant 0 : i32
    return %arg0, %c0_i32 : i32, i32
  }
  func.func @transform_1(%arg0: i32) -> (i32, i32) {
    %c0_i32 = arith.constant 0 : i32
    %c0_i32_0 = arith.constant 0 : i32
    %c0_i32_1 = arith.constant 0 : i32
    return %c0_i32, %c0_i32_0 : i32, i32
  }
  func.func @transform_2(%arg0: i32) -> (i32, i32) {
    %c0_i32 = arith.constant 0 : i32
    %c0_i32_0 = arith.constant 0 : i32
    %c0_i32_1 = arith.constant 0 : i32
    return %c0_i32, %c0_i32_0 : i32, i32
  }
  func.func @transform_3(%arg0: i32) -> (i32, i32) {
    %c0_i32 = arith.constant 0 : i32
    %c0_i32_0 = arith.constant 0 : i32
    return %arg0, %c0_i32 : i32, i32
  }
}

</mosaic_0001>

<bundles_post_ra>
// kernel: tpu_custom_call.1
= control target key start
LH: loop header
LB: loop body
LE: loop exit
PB: predicated region body
PF: predicated region fallthrough
CT: control target
= control target key end

     0   :  { %8 = vsyncpa [#allocation3], 0  ;;  %s395_s0 = inlined_call_operand.hbm [shape: bf16[16,32], index: 0, kind: input, shape index: {}]   ;;  %s396_s1 = inlined_call_operand.vmem [shape: bf16[32,32], index: 1, kind: input, shape index: {}]   ;;  %s397_s2 = inlined_call_operand.vmem [shape: bf16[32,4], index: 2, kind: input, shape index: {}]   ;;  %s398_s3 = inlined_call_operand.hbm [shape: f32[8,8], index: 3, kind: output, shape index: {}]  }
   0x1   :  { %9 = vsyncpa [#allocation4], 0  ;;  %s327_s12 = smov [#allocation2]   ;;  %s279_s16 = scalar_lea.hbm %s395_s0, 128 }
   0x2   :  { %s15_s13 = sshll.u32 %s327_s12, 4  ;;  %p280_p0 = scmp.ne.s32.totalorder %s395_s0, %s279_s16  ;;  %s16_s13 = int_to_ptr.vmem [resolvable:$true] %s15_s13 }
   0x3   :  { %p283_p1 = scmp.lt.u32.totalorder %s279_s16, %s395_s0 }
   0x5   :  { %p285_p2 = pnand %p283_p1, %p280_p0 }
   0x7   :  { %288 = shalt.err (!%p285_p2)
}
   0x8   :  { %s289_s21 = scalar_lea.vmem %s16_s13, 128  ;;  %p294_p4 = scmp.lt.s32.totalorder %s16_s13, %s16_s13 }
   0x9   :  { %p290_p3 = scmp.ne.s32.totalorder %s16_s13, %s289_s21  ;;  %p295_p5 = scmp.lt.s32.totalorder %s289_s21, %s289_s21 }
   0xb   :  { %p296_p6 = por %p295_p5, %p294_p4 }
   0xd   :  { %p297_p7 = pnand %p296_p6, %p290_p3 }
   0xf   :  { %300 = shalt.err (!%p297_p7)
}
  0x10   :  { %s328_s22 = smov 64   ;;  %s329_s23 = smov 4  }
  0x11   :  { %21 = dma.hbm_to_vmem [thread:$0]  %s395_s0, 128, %s16_s13, [#allocation3], %s328_s22, %s328_s22, %s329_s23  }
  0x12   :  { %323 = dma.done.wait [#allocation3], 128  }
  0x13   :  { %324 = vsyncadd [#allocation3], 4294967168  ;;  %v330_v0 = vmov 0.0   ;;  %vm331_vm0 = vmmov 0   ;;  %v262_v1 = vld [vmem:[%s396_s1] sm:$0xff]   ;;  %v263_v2 = vld [vmem:[%s396_s1 + $0x8] sm:$0xff]  }
  0x14   :  { %240 = vmatprep.subr.bf16.mxu0 %v330_v0  ;;  %244 = vmatprep.mubr.msk.bf16.mxu0 %vm331_vm0, %v330_v0  ;;  %v265_v3 = vld [vmem:[%s397_s2] sm:$0xff]   ;;  %v266_v5 = vld [vmem:[%s397_s2 + $0x8] sm:$0xff]   ;;  %vm57_vm1 = vcmask 261120   ;;  %vm191_vm2 = vcmask 126016   ;;  %vm179_vm3 = vcmask 60416   ;;  %s332_s1 = smov 120  }
  0x15   :  { %248 = vmatprep.subr.bf16.mxu1 %v330_v0  ;;  %250 = vmatprep.mubr.msk.bf16.mxu1 %vm331_vm0, %v330_v0  ;;  %v264_v4 = vld [vmem:[#allocation2] sm:$0xff]   ;;  %s333_s2 = smov [#allocation5]  }
  0x16   :  { %241 = vmatpush3.bf16.msra.mxu0 %v262_v1  ;;  %117 = vxpose.xlu0.c.b16.start [1/2] (short) (narrow) %v265_v3, 16  ;;  %s219_s6 = sshll.u32 %s333_s2, 4  ;;  %s220_s6 = int_to_ptr.vmem [resolvable:$true] %s219_s6 }
  0x17   :  { %242 = vmatprep.subr.bf16.mxu0 %v330_v0  ;;  %s301_s7 = scalar_lea.vmem %s220_s6, 128  ;;  %p306_p9 = scmp.lt.s32.totalorder %s220_s6, %s220_s6 }
  0x18   :  { %p302_p8 = scmp.ne.s32.totalorder %s220_s6, %s301_s7  ;;  %p307_p10 = scmp.lt.s32.totalorder %s301_s7, %s301_s7 }
  0x1a   :  { %243 = vmatpush3.bf16.msra.mxu0 %v263_v2  ;;  %118 = vxpose.xlu0.c.b16.end [2/2] (short) (narrow) %v266_v5, 16  ;;  %p308_p11 = por %p307_p10, %p306_p9 }
  0x1c   :  { %p309_p12 = pnand %p308_p11, %p302_p8 }
  0x1d   :  { %245 = vmatmul.mubr.msk.bf16.vlgmr.msra.gmra.mrb[0].mxu0 %vm57_vm1, %v264_v4 }
  0x7c   :  { %v125_v14 = vpop.trf.xlu0 }
  0xf0   :  { %v95_v6 = vpop.f32.mrb[0].mxu0 }
  0xf1   :  { %v246_v7 = vpop.f32.mrb[1].mxu0  ;;  %267 = vtanh.f32 %v95_v6 }
  0xf2   :  { %v98_v8 = vpop.f32.mrb[2].mxu0 }
  0xf3   :  { %269 = vtanh.f32 %v98_v8  ;;  %v247_v9 = vpop.f32.mrb[3].mxu0 }
  0xfb   :  { %v268_v10 = vpop.eup %267 }
  0xfd   :  { %v270_v11 = vpop.eup %269 }
  0xfe   :  { %v104_v12 = vpack.c.bf16 %v270_v11, %v268_v10 }
 0x100   :  { %v137_v13 = vsel %vm57_vm1, %v104_v12, 0 }
 0x101   :  { %249 = vmatpush3.bf16.xpose.msra.mxu1 %v137_v13 }
 0x108   :  { %251 = vmatmul.mubr.msk.bf16.vlgmr.msra.gmra.mrb[0].mxu1 %vm57_vm1, %v125_v14 }
 0x1db   :  { %v173_v15 = vpop.f32.mrb[0].mxu1 }
 0x1dc   :  { %v252_v16 = vpop.f32.mrb[1].mxu1  ;;  %v192_v17 = vsel %vm191_vm2, %v173_v15, -inf  ;;  %v180_v18 = vsel %vm179_vm3, %v173_v15, -inf }
 0x1dd   :  { %193 = vmax.xlane.f32.xlu1 %v192_v17  ;;  %181 = vmax.xlane.f32.xlu0 %v180_v18  ;;  %v176_v19 = vpop.f32.mrb[2].mxu1 }
 0x1de   :  { %v253_v20 = vpop.f32.mrb[3].mxu1 }
 0x26a   :  { %v194_v21 = vpop.xlane.xlu1 %193  ;;  %v182_v25 = vpop.xlane.xlu0 %181 }
 0x26b   :  { %v195_v22 = vsub.f32 %v173_v15, %v194_v21  ;;  %v183_v26 = vsub.f32 %v173_v15, %v182_v25 }
 0x26d   :  { %v196_v23 = vmul.f32 1.442695, %v195_v22  ;;  %v184_v27 = vmul.f32 1.442695, %v183_v26 }
 0x26f   :  { %271 = vpow2.f32 %v196_v23 }
 0x270   :  { %273 = vpow2.f32 %v184_v27 }
 0x279   :  { %v272_v24 = vpop.eup %271 }
 0x27a   :  { %199 = vrot.lane.b32.xlu1 %v272_v24, %s332_s1  ;;  %v274_v28 = vpop.eup %273 }
 0x27b   :  { %v186_v29 = vsel %vm179_vm3, %v274_v28, 0.0 }
 0x29e   :  { %187 = vadd.xlane.f32.xlu1 %v186_v29 }
 0x2ec   :  { %v200_v30 = vpop.permute.xlu1 %199 }
 0x2ed   :  { %v202_v31 = vsel %vm179_vm3, %v200_v30, 0.0 }
 0x2ee   :  { %203 = vadd.xlane.f32.xlu0 %v202_v31 }
 0x32b   :  { %v188_v32 = vpop.xlane.xlu1 %187 }
 0x32c   :  { %275 = vrcp.f32 %v188_v32 }
 0x336   :  { %v276_v33 = vpop.eup %275 }
 0x337   :  { %v190_v34 = vmul.f32 %v276_v33, %v274_v28 }
 0x339   :  { %207 = vst.msk [vmem:[#allocation5] sm:$0xf] %vm179_vm3, %v190_v34 }
 0x37b   :  { %v204_v35 = vpop.xlane.xlu0 %203 }
 0x37c   :  { %277 = vrcp.f32 %v204_v35 }
 0x386   :  { %v278_v36 = vpop.eup %277 }
 0x387   :  { %v206_v37 = vmul.f32 %v278_v36, %v272_v24 }
 0x389   :  { %209 = vrot.lane.b32.xlu0 %v206_v37, %s332_s1 }
 0x3fb   :  { %v210_v38 = vpop.permute.xlu0 %209 }
 0x3fc   :  { %212 = vst.msk [vmem:[#allocation5 + $0x4] sm:$0xf] %vm179_vm3, %v210_v38 }
 0x3fd   :  { %312 = shalt.err (!%p309_p12)
}
 0x3fe   :  { %s313_s10 = scalar_lea.hbm %s398_s3, 128 }
 0x3ff   :  { %p314_p13 = scmp.ne.s32.totalorder %s398_s3, %s313_s10  ;;  %p317_p0 = scmp.lt.u32.totalorder %s313_s10, %s398_s3 }
 0x401   :  { %p319_p1 = pnand %p317_p0, %p314_p13 }
 0x403   :  { %322 = shalt.err (!%p319_p1)
}
 0x404   :  { %222 = dma.vmem_to_hbm [thread:$0]  %s220_s6, 128, %s398_s3, [#allocation4]  }
 0x405   :  { %325 = dma.done.wait [#allocation4], 128  }
 0x406   :  { %326 = vsyncadd [#allocation4], 4294967168 }
 0x407   :  { %226 = vsyncpa [#allocation3], 1 }
 0x408   :  { %227 = vsyncpa [#allocation4], 1 }

</bundles_post_ra>
